<compile_context>
chip_gen: v5e
topology: v5e:2x2
jax: 0.10.0
libtpu: 0.0.40
codegen_flags: <defaults>
</compile_context>

<pallas_src>
import functools
import math

import jax
import jax.numpy as jnp
from jax import lax
from jax.experimental import pallas as pl
from jax.experimental.pallas import tpu as pltpu


def _mha_kernel(xf_ref, bias_ref,
                wqkv_ref, bqkv_ref, wo_ref, bo_ref,
                out_ref, attn_ref,
                *, batch_tile: int, seq: int, heads: int, head_dim: int,
                dim: int):
    """One tile of `batch_tile` batch elements per grid step.

    xf_ref   : (TB*S, D)      VMEM bf16   (batch rows flattened)
    bias_ref : (TB, S, S)     VMEM bf16   additive mask bias (0 keep / -1e9 drop)
    wqkv_ref : (D, 3D)        VMEM bf16   fused q|k|v weight (in, out)
    bqkv_ref : (1, 3D)        VMEM f32    fused q|k|v bias
    wo_ref   : (D, D)         VMEM bf16
    bo_ref   : (1, D)         VMEM f32
    out_ref  : (TB*S, D)      VMEM out dtype
    attn_ref : (TB, H, S, S)  VMEM attn dtype
    """
    xf = xf_ref[...]                                           # (TB*S, D) bf16

    # Fused Q|K|V projection: one MXU matmul, M = TB*S rows, N = 3D lanes.
    qkv = jnp.dot(xf, wqkv_ref[...],
                  preferred_element_type=jnp.float32) + bqkv_ref[...]

    scale = head_dim ** (-0.5)
    q = (qkv[:, :dim] * scale).astype(jnp.bfloat16)            # fold scale once
    k = qkv[:, dim:2 * dim].astype(jnp.bfloat16)
    v = qkv[:, 2 * dim:].astype(jnp.bfloat16)

    ctx_rows = []
    for b in range(batch_tile):                                # static; TB small
        rows = slice(b * seq, (b + 1) * seq)
        bias_b = bias_ref[b].astype(jnp.float32)               # (S, S)
        ctx_heads = []
        for h in range(heads):                                 # static; H small
            cols = slice(h * head_dim, (h + 1) * head_dim)
            qh = q[rows, cols]                                 # (S, hd)
            kh = k[rows, cols]                                 # (S, hd)
            vh = v[rows, cols]                                 # (S, hd)

            # Contract last dims of Q and K (trans_b matmul; no XLU transpose).
            s = lax.dot_general(qh, kh, (((1,), (1,)), ((), ())),
                                preferred_element_type=jnp.float32)
            s = s + bias_b                                     # (S, S) f32

            # Numerically-stable softmax (f32), reciprocal on the EUP.
            m = jnp.max(s, axis=-1, keepdims=True)
            e = jnp.exp(s - m)
            denom = jnp.sum(e, axis=-1, keepdims=True)
            w = e * pl.reciprocal(denom, approx=True)          # (S, S) f32

            # attn_dropout is identity in eval mode.
            attn_ref[b, h, :, :] = w.astype(attn_ref.dtype)

            ctx_heads.append(jnp.dot(w.astype(jnp.bfloat16), vh,
                                     preferred_element_type=jnp.float32))
        ctx_rows.append(jnp.concatenate(ctx_heads, axis=-1))   # (S, D)

    # One full-width (TB*S, D) context value fed straight into the out proj.
    ctx = jnp.concatenate(ctx_rows, axis=0).astype(jnp.bfloat16)
    out = jnp.dot(ctx, wo_ref[...],
                  preferred_element_type=jnp.float32) + bo_ref[...]
    # to_out Dropout is identity in eval mode.
    out_ref[...] = out.astype(out_ref.dtype)


def _pick_batch_tile(batch: int, seq: int, target_rows: int = 256) -> int:
    """Choose TB so TB*S approaches the MXU height and B % TB == 0."""
    tb = max(1, min(batch, target_rows // max(seq, 1)))
    while batch % tb:
        tb -= 1
    return tb


def multi_head_attention(x, params, mask=None, *, heads: int,
                         batch_tile=None,
                         out_dtype=jnp.float32, attn_dtype=jnp.float32):
    """x: (B, S, D) float32. params: dict of (in,out) f32 weights / (1,D) biases.
    mask: optional (B, S, S); nonzero = keep, zero = masked out.
    Returns (out (B,S,D), attn_weights (B,H,S,S)).  Pass bf16 for out_dtype /
    attn_dtype to halve HBM writeback if downstream accepts it."""
    B, S, D = x.shape
    assert D % heads == 0
    head_dim = D // heads

    if batch_tile is None:
        batch_tile = _pick_batch_tile(B, S)
    assert B % batch_tile == 0
    TB = batch_tile

    # Additive mask bias computed once on the XLA side; bf16 halves its DMA.
    if mask is None:
        bias = jnp.zeros((B, S, S), dtype=jnp.bfloat16)
    else:
        bias = jnp.where(mask == 0, jnp.float32(-1e9),
                         jnp.float32(0.0)).astype(jnp.bfloat16)

    # Flatten batch rows so the projection matmuls see M = TB*S.
    x_flat = x.reshape(B * S, D).astype(jnp.bfloat16)

    # Fused q|k|v weight/bias; bf16 weights, f32 biases (added post-accumulate).
    wqkv = jnp.concatenate([params["wq"], params["wk"], params["wv"]],
                           axis=1).astype(jnp.bfloat16)          # (D, 3D)
    bqkv = jnp.concatenate([params["bq"], params["bk"], params["bv"]],
                           axis=1)                               # (1, 3D) f32
    wo = params["wo"].astype(jnp.bfloat16)
    bo = params["bo"]

    kernel = functools.partial(_mha_kernel, batch_tile=TB, seq=S,
                               heads=heads, head_dim=head_dim, dim=D)

    out_flat, attn = pl.pallas_call(
        kernel,
        out_shape=(
            jax.ShapeDtypeStruct((B * S, D), out_dtype),
            jax.ShapeDtypeStruct((B, heads, S, S), attn_dtype),
        ),
        grid_spec=pltpu.PrefetchScalarGridSpec(
            num_scalar_prefetch=0,
            grid=(B // TB,),
            in_specs=[
                pl.BlockSpec((TB * S, D), lambda i: (i, 0)),        # x (flat)
                pl.BlockSpec((TB, S, S), lambda i: (i, 0, 0)),      # mask bias
                pl.BlockSpec((D, 3 * D), lambda i: (0, 0)),         # wqkv
                pl.BlockSpec((1, 3 * D), lambda i: (0, 0)),         # bqkv
                pl.BlockSpec((D, D), lambda i: (0, 0)),             # wo
                pl.BlockSpec((1, D), lambda i: (0, 0)),             # bo
            ],
            out_specs=[
                pl.BlockSpec((TB * S, D), lambda i: (i, 0)),
                pl.BlockSpec((TB, heads, S, S), lambda i: (i, 0, 0, 0)),
            ],
        ),
        compiler_params=pltpu.CompilerParams(
            dimension_semantics=("parallel",)),
    )(x_flat, bias, wqkv, bqkv, wo, bo)

    return out_flat.reshape(B, S, D), attn


def init_params(key, dim):
    """Deterministic init mimicking nn.Linear defaults (uniform +-1/sqrt(fan_in)).
    Weights are stored as (in_dim, out_dim)."""
    bound = 1.0 / math.sqrt(dim)
    keys = jax.random.split(key, 8)
    u = lambda k, shape: jax.random.uniform(k, shape, jnp.float32, -bound, bound)
    return {
        "wq": u(keys[0], (dim, dim)), "bq": u(keys[1], (1, dim)),
        "wk": u(keys[2], (dim, dim)), "bk": u(keys[3], (1, dim)),
        "wv": u(keys[4], (dim, dim)), "bv": u(keys[5], (1, dim)),
        "wo": u(keys[6], (dim, dim)), "bo": u(keys[7], (1, dim)),
    }


def _reference(x, params, mask, heads):
    """Plain-JAX f32 reference mirroring the PyTorch forward (dropout=eval)."""
    B, S, D = x.shape
    hd = D // heads
    q = x @ params["wq"] + params["bq"]
    k = x @ params["wk"] + params["bk"]
    v = x @ params["wv"] + params["bv"]
    reshape = lambda t: t.reshape(B, S, heads, hd).transpose(0, 2, 1, 3)
    q, k, v = reshape(q), reshape(k), reshape(v)
    scores = jnp.einsum("bhqd,bhkd->bhqk", q, k) * (hd ** -0.5)
    scores = jnp.where(mask[:, None, :, :] == 0.0, -1e9, scores)
    w = jax.nn.softmax(scores, axis=-1)
    ctx = jnp.einsum("bhqk,bhkd->bhqd", w, v)
    ctx = ctx.transpose(0, 2, 1, 3).reshape(B, S, D)
    out = ctx @ params["wo"] + params["bo"]
    return out, w


if __name__ == "__main__":
    B, S, D, H = 2, 8, 32, 4

    key = jax.random.PRNGKey(0)
    kx, kp, km = jax.random.split(key, 3)
    x = jax.random.normal(kx, (B, S, D), dtype=jnp.float32)
    params = init_params(kp, D)
    # a simple deterministic mask: keep everything except a few positions
    mask = (jax.random.uniform(km, (B, S, S)) > 0.1).astype(jnp.float32)

    out, attn = multi_head_attention(x, params, mask=mask, heads=H)
    out = jax.block_until_ready(out)
    attn = jax.block_until_ready(attn)

    ref_out, ref_attn = _reference(x, params, mask, H)
    assert out.shape == (B, S, D) and attn.shape == (B, H, S, S)
    # Tolerances loosened for bf16 MXU inputs + approximate reciprocal.
    assert jnp.allclose(out, ref_out, atol=2e-2, rtol=2e-2)
    assert jnp.allclose(attn, ref_attn, atol=2e-2, rtol=2e-2)

    print("KERNEL_OK")
</pallas_src>

<mosaic_0001>
module attributes {stable_mosaic.version = 11 : i64} {
  func.func @_mha_kernel(%arg0: i32, %arg1: memref<16x32xbf16, #tpu.memory_space<vmem>>, %arg2: memref<2x8x8xbf16, #tpu.memory_space<vmem>>, %arg3: memref<32x96xbf16, #tpu.memory_space<vmem>>, %arg4: memref<1x96xf32, #tpu.memory_space<vmem>>, %arg5: memref<32x32xbf16, #tpu.memory_space<vmem>>, %arg6: memref<1x32xf32, #tpu.memory_space<vmem>>, %arg7: memref<16x32xf32, #tpu.memory_space<vmem>>, %arg8: memref<2x4x8x8xf32, #tpu.memory_space<vmem>>) attributes {dimension_semantics = [#tpu.dimension_semantics<parallel>], iteration_bounds = array<i64: 1>, scalar_prefetch = 0 : i64, scratch_operands = 0 : i64, tpu.core_type = #tpu.core_type<tc>, window_params = [{transform_indices = @transform_0, window_bounds = array<i64: 16, 32>}, {transform_indices = @transform_1, window_bounds = array<i64: 2, 8, 8>}, {pipeline_mode = #tpu.pipeline_mode<synchronous>, transform_indices = @transform_2, window_bounds = array<i64: 32, 96>}, {pipeline_mode = #tpu.pipeline_mode<synchronous>, transform_indices = @transform_3, window_bounds = array<i64: 1, 96>}, {pipeline_mode = #tpu.pipeline_mode<synchronous>, transform_indices = @transform_4, window_bounds = array<i64: 32, 32>}, {pipeline_mode = #tpu.pipeline_mode<synchronous>, transform_indices = @transform_5, window_bounds = array<i64: 1, 32>}, {transform_indices = @transform_6, window_bounds = array<i64: 16, 32>}, {transform_indices = @transform_7, window_bounds = array<i64: 2, 4, 8, 8>}]} {
    %c0 = arith.constant 0 : index
    %c0_0 = arith.constant 0 : index
    %0 = vector.load %arg1[%c0, %c0_0] : memref<16x32xbf16, #tpu.memory_space<vmem>>, vector<16x32xbf16>
    %c0_1 = arith.constant 0 : index
    %c0_2 = arith.constant 0 : index
    %1 = vector.load %arg3[%c0_1, %c0_2] : memref<32x96xbf16, #tpu.memory_space<vmem>>, vector<32x96xbf16>
    %cst = arith.constant dense<0.000000e+00> : vector<16x96xf32>
    %2 = tpu.matmul %0, %1, %cst {dimension_numbers = #tpu.dot_dimension_numbers<[1], [0], [0], [1], [0, 0, 1, 1], [], []>} : vector<16x32xbf16>, vector<32x96xbf16>, vector<16x96xf32> -> vector<16x96xf32>
    %c0_3 = arith.constant 0 : index
    %c0_4 = arith.constant 0 : index
    %3 = vector.load %arg4[%c0_3, %c0_4] : memref<1x96xf32, #tpu.memory_space<vmem>>, vector<1x96xf32>
    %4 = vector.broadcast %3 : vector<1x96xf32> to vector<16x96xf32>
    %5 = arith.addf %2, %4 : vector<16x96xf32>
    %6 = vector.extract_strided_slice %5 {offsets = [0, 0], sizes = [16, 32], strides = [1, 1]} : vector<16x96xf32> to vector<16x32xf32>
    %cst_5 = arith.constant 0.353553385 : f32
    %7 = vector.broadcast %cst_5 : f32 to vector<16x32xf32>
    %8 = arith.mulf %6, %7 : vector<16x32xf32>
    %9 = arith.truncf %8 : vector<16x32xf32> to vector<16x32xbf16>
    %10 = vector.extract_strided_slice %5 {offsets = [0, 32], sizes = [16, 32], strides = [1, 1]} : vector<16x96xf32> to vector<16x32xf32>
    %11 = arith.truncf %10 : vector<16x32xf32> to vector<16x32xbf16>
    %12 = vector.extract_strided_slice %5 {offsets = [0, 64], sizes = [16, 32], strides = [1, 1]} : vector<16x96xf32> to vector<16x32xf32>
    %13 = arith.truncf %12 : vector<16x32xf32> to vector<16x32xbf16>
    %c0_6 = arith.constant 0 : index
    %c0_7 = arith.constant 0 : index
    %c0_8 = arith.constant 0 : index
    %14 = vector.load %arg2[%c0_6, %c0_7, %c0_8] : memref<2x8x8xbf16, #tpu.memory_space<vmem>>, vector<1x8x8xbf16>
    %15 = vector.shape_cast %14 : vector<1x8x8xbf16> to vector<8x8xbf16>
    %16 = arith.extf %15 : vector<8x8xbf16> to vector<8x8xf32>
    %17 = vector.extract_strided_slice %9 {offsets = [0, 0], sizes = [8, 8], strides = [1, 1]} : vector<16x32xbf16> to vector<8x8xbf16>
    %18 = vector.extract_strided_slice %11 {offsets = [0, 0], sizes = [8, 8], strides = [1, 1]} : vector<16x32xbf16> to vector<8x8xbf16>
    %19 = vector.extract_strided_slice %13 {offsets = [0, 0], sizes = [8, 8], strides = [1, 1]} : vector<16x32xbf16> to vector<8x8xbf16>
    %cst_9 = arith.constant dense<0.000000e+00> : vector<8x8xf32>
    %20 = tpu.matmul %17, %18, %cst_9 {dimension_numbers = #tpu.dot_dimension_numbers<[1], [1], [0], [0], [0, 0, 1, 0], [], []>} : vector<8x8xbf16>, vector<8x8xbf16>, vector<8x8xf32> -> vector<8x8xf32>
    %21 = arith.addf %20, %16 : vector<8x8xf32>
    %cst_10 = arith.constant dense<0xFF800000> : vector<8xf32>
    %22 = vector.multi_reduction <maximumf>, %21, %cst_10 [1] : vector<8x8xf32> to vector<8xf32>
    %23 = vector.shape_cast %22 : vector<8xf32> to vector<8x1xf32>
    %24 = vector.broadcast %23 : vector<8x1xf32> to vector<8x8xf32>
    %25 = arith.subf %21, %24 : vector<8x8xf32>
    %26 = math.exp %25 : vector<8x8xf32>
    %cst_11 = arith.constant dense<0.000000e+00> : vector<8xf32>
    %27 = vector.multi_reduction <add>, %26, %cst_11 [1] : vector<8x8xf32> to vector<8xf32>
    %28 = vector.shape_cast %27 : vector<8xf32> to vector<8x1xf32>
    %29 = tpu.reciprocal %28 {approx = true} : vector<8x1xf32> -> vector<8x1xf32>
    %30 = vector.broadcast %29 : vector<8x1xf32> to vector<8x8xf32>
    %31 = arith.mulf %26, %30 : vector<8x8xf32>
    %c0_12 = arith.constant 0 : index
    %c0_13 = arith.constant 0 : index
    %c0_14 = arith.constant 0 : index
    %c0_15 = arith.constant 0 : index
    %32 = vector.load %arg8[%c0_12, %c0_13, %c0_14, %c0_15] : memref<2x4x8x8xf32, #tpu.memory_space<vmem>>, vector<1x1x8x8xf32>
    %33 = vector.shape_cast %32 : vector<1x1x8x8xf32> to vector<8x8xf32>
    %34 = vector.shape_cast %31 : vector<8x8xf32> to vector<1x1x8x8xf32>
    tpu.vector_store %arg8[%c0_12, %c0_13, %c0_14, %c0_15], %34 {strides = array<i32>} : memref<2x4x8x8xf32, #tpu.memory_space<vmem>>, vector<1x1x8x8xf32>,
    %35 = arith.truncf %31 : vector<8x8xf32> to vector<8x8xbf16>
    %cst_16 = arith.constant dense<0.000000e+00> : vector<8x8xf32>
    %36 = tpu.matmul %35, %19, %cst_16 {dimension_numbers = #tpu.dot_dimension_numbers<[1], [0], [0], [1], [0, 0, 1, 1], [], []>} : vector<8x8xbf16>, vector<8x8xbf16>, vector<8x8xf32> -> vector<8x8xf32>
    %37 = vector.extract_strided_slice %9 {offsets = [0, 8], sizes = [8, 8], strides = [1, 1]} : vector<16x32xbf16> to vector<8x8xbf16>
    %38 = vector.extract_strided_slice %11 {offsets = [0, 8], sizes = [8, 8], strides = [1, 1]} : vector<16x32xbf16> to vector<8x8xbf16>
    %39 = vector.extract_strided_slice %13 {offsets = [0, 8], sizes = [8, 8], strides = [1, 1]} : vector<16x32xbf16> to vector<8x8xbf16>
    %cst_17 = arith.constant dense<0.000000e+00> : vector<8x8xf32>
    %40 = tpu.matmul %37, %38, %cst_17 {dimension_numbers = #tpu.dot_dimension_numbers<[1], [1], [0], [0], [0, 0, 1, 0], [], []>} : vector<8x8xbf16>, vector<8x8xbf16>, vector<8x8xf32> -> vector<8x8xf32>
    %41 = arith.addf %40, %16 : vector<8x8xf32>
    %cst_18 = arith.constant dense<0xFF800000> : vector<8xf32>
    %42 = vector.multi_reduction <maximumf>, %41, %cst_18 [1] : vector<8x8xf32> to vector<8xf32>
    %43 = vector.shape_cast %42 : vector<8xf32> to vector<8x1xf32>
    %44 = vector.broadcast %43 : vector<8x1xf32> to vector<8x8xf32>
    %45 = arith.subf %41, %44 : vector<8x8xf32>
    %46 = math.exp %45 : vector<8x8xf32>
    %cst_19 = arith.constant dense<0.000000e+00> : vector<8xf32>
    %47 = vector.multi_reduction <add>, %46, %cst_19 [1] : vector<8x8xf32> to vector<8xf32>
    %48 = vector.shape_cast %47 : vector<8xf32> to vector<8x1xf32>
    %49 = tpu.reciprocal %48 {approx = true} : vector<8x1xf32> -> vector<8x1xf32>
    %50 = vector.broadcast %49 : vector<8x1xf32> to vector<8x8xf32>
    %51 = arith.mulf %46, %50 : vector<8x8xf32>
    %c0_20 = arith.constant 0 : index
    %c1 = arith.constant 1 : index
    %c0_21 = arith.constant 0 : index
    %c0_22 = arith.constant 0 : index
    %52 = vector.load %arg8[%c0_20, %c1, %c0_21, %c0_22] : memref<2x4x8x8xf32, #tpu.memory_space<vmem>>, vector<1x1x8x8xf32>
    %53 = vector.shape_cast %52 : vector<1x1x8x8xf32> to vector<8x8xf32>
    %54 = vector.shape_cast %51 : vector<8x8xf32> to vector<1x1x8x8xf32>
    tpu.vector_store %arg8[%c0_20, %c1, %c0_21, %c0_22], %54 {strides = array<i32>} : memref<2x4x8x8xf32, #tpu.memory_space<vmem>>, vector<1x1x8x8xf32>,
    %55 = arith.truncf %51 : vector<8x8xf32> to vector<8x8xbf16>
    %cst_23 = arith.constant dense<0.000000e+00> : vector<8x8xf32>
    %56 = tpu.matmul %55, %39, %cst_23 {dimension_numbers = #tpu.dot_dimension_numbers<[1], [0], [0], [1], [0, 0, 1, 1], [], []>} : vector<8x8xbf16>, vector<8x8xbf16>, vector<8x8xf32> -> vector<8x8xf32>
    %57 = vector.extract_strided_slice %9 {offsets = [0, 16], sizes = [8, 8], strides = [1, 1]} : vector<16x32xbf16> to vector<8x8xbf16>
    %58 = vector.extract_strided_slice %11 {offsets = [0, 16], sizes = [8, 8], strides = [1, 1]} : vector<16x32xbf16> to vector<8x8xbf16>
    %59 = vector.extract_strided_slice %13 {offsets = [0, 16], sizes = [8, 8], strides = [1, 1]} : vector<16x32xbf16> to vector<8x8xbf16>
    %cst_24 = arith.constant dense<0.000000e+00> : vector<8x8xf32>
    %60 = tpu.matmul %57, %58, %cst_24 {dimension_numbers = #tpu.dot_dimension_numbers<[1], [1], [0], [0], [0, 0, 1, 0], [], []>} : vector<8x8xbf16>, vector<8x8xbf16>, vector<8x8xf32> -> vector<8x8xf32>
    %61 = arith.addf %60, %16 : vector<8x8xf32>
    %cst_25 = arith.constant dense<0xFF800000> : vector<8xf32>
    %62 = vector.multi_reduction <maximumf>, %61, %cst_25 [1] : vector<8x8xf32> to vector<8xf32>
    %63 = vector.shape_cast %62 : vector<8xf32> to vector<8x1xf32>
    %64 = vector.broadcast %63 : vector<8x1xf32> to vector<8x8xf32>
    %65 = arith.subf %61, %64 : vector<8x8xf32>
    %66 = math.exp %65 : vector<8x8xf32>
    %cst_26 = arith.constant dense<0.000000e+00> : vector<8xf32>
    %67 = vector.multi_reduction <add>, %66, %cst_26 [1] : vector<8x8xf32> to vector<8xf32>
    %68 = vector.shape_cast %67 : vector<8xf32> to vector<8x1xf32>
    %69 = tpu.reciprocal %68 {approx = true} : vector<8x1xf32> -> vector<8x1xf32>
    %70 = vector.broadcast %69 : vector<8x1xf32> to vector<8x8xf32>
    %71 = arith.mulf %66, %70 : vector<8x8xf32>
    %c0_27 = arith.constant 0 : index
    %c2 = arith.constant 2 : index
    %c0_28 = arith.constant 0 : index
    %c0_29 = arith.constant 0 : index
    %72 = vector.load %arg8[%c0_27, %c2, %c0_28, %c0_29] : memref<2x4x8x8xf32, #tpu.memory_space<vmem>>, vector<1x1x8x8xf32>
    %73 = vector.shape_cast %72 : vector<1x1x8x8xf32> to vector<8x8xf32>
    %74 = vector.shape_cast %71 : vector<8x8xf32> to vector<1x1x8x8xf32>
    tpu.vector_store %arg8[%c0_27, %c2, %c0_28, %c0_29], %74 {strides = array<i32>} : memref<2x4x8x8xf32, #tpu.memory_space<vmem>>, vector<1x1x8x8xf32>,
    %75 = arith.truncf %71 : vector<8x8xf32> to vector<8x8xbf16>
    %cst_30 = arith.constant dense<0.000000e+00> : vector<8x8xf32>
    %76 = tpu.matmul %75, %59, %cst_30 {dimension_numbers = #tpu.dot_dimension_numbers<[1], [0], [0], [1], [0, 0, 1, 1], [], []>} : vector<8x8xbf16>, vector<8x8xbf16>, vector<8x8xf32> -> vector<8x8xf32>
    %77 = vector.extract_strided_slice %9 {offsets = [0, 24], sizes = [8, 8], strides = [1, 1]} : vector<16x32xbf16> to vector<8x8xbf16>
    %78 = vector.extract_strided_slice %11 {offsets = [0, 24], sizes = [8, 8], strides = [1, 1]} : vector<16x32xbf16> to vector<8x8xbf16>
    %79 = vector.extract_strided_slice %13 {offsets = [0, 24], sizes = [8, 8], strides = [1, 1]} : vector<16x32xbf16> to vector<8x8xbf16>
    %cst_31 = arith.constant dense<0.000000e+00> : vector<8x8xf32>
    %80 = tpu.matmul %77, %78, %cst_31 {dimension_numbers = #tpu.dot_dimension_numbers<[1], [1], [0], [0], [0, 0, 1, 0], [], []>} : vector<8x8xbf16>, vector<8x8xbf16>, vector<8x8xf32> -> vector<8x8xf32>
    %81 = arith.addf %80, %16 : vector<8x8xf32>
    %cst_32 = arith.constant dense<0xFF800000> : vector<8xf32>
    %82 = vector.multi_reduction <maximumf>, %81, %cst_32 [1] : vector<8x8xf32> to vector<8xf32>
    %83 = vector.shape_cast %82 : vector<8xf32> to vector<8x1xf32>
    %84 = vector.broadcast %83 : vector<8x1xf32> to vector<8x8xf32>
    %85 = arith.subf %81, %84 : vector<8x8xf32>
    %86 = math.exp %85 : vector<8x8xf32>
    %cst_33 = arith.constant dense<0.000000e+00> : vector<8xf32>
    %87 = vector.multi_reduction <add>, %86, %cst_33 [1] : vector<8x8xf32> to vector<8xf32>
    %88 = vector.shape_cast %87 : vector<8xf32> to vector<8x1xf32>
    %89 = tpu.reciprocal %88 {approx = true} : vector<8x1xf32> -> vector<8x1xf32>
    %90 = vector.broadcast %89 : vector<8x1xf32> to vector<8x8xf32>
    %91 = arith.mulf %86, %90 : vector<8x8xf32>
    %c0_34 = arith.constant 0 : index
    %c3 = arith.constant 3 : index
    %c0_35 = arith.constant 0 : index
    %c0_36 = arith.constant 0 : index
    %92 = vector.load %arg8[%c0_34, %c3, %c0_35, %c0_36] : memref<2x4x8x8xf32, #tpu.memory_space<vmem>>, vector<1x1x8x8xf32>
    %93 = vector.shape_cast %92 : vector<1x1x8x8xf32> to vector<8x8xf32>
    %94 = vector.shape_cast %91 : vector<8x8xf32> to vector<1x1x8x8xf32>
    tpu.vector_store %arg8[%c0_34, %c3, %c0_35, %c0_36], %94 {strides = array<i32>} : memref<2x4x8x8xf32, #tpu.memory_space<vmem>>, vector<1x1x8x8xf32>,
    %95 = arith.truncf %91 : vector<8x8xf32> to vector<8x8xbf16>
    %cst_37 = arith.constant dense<0.000000e+00> : vector<8x8xf32>
    %96 = tpu.matmul %95, %79, %cst_37 {dimension_numbers = #tpu.dot_dimension_numbers<[1], [0], [0], [1], [0, 0, 1, 1], [], []>} : vector<8x8xbf16>, vector<8x8xbf16>, vector<8x8xf32> -> vector<8x8xf32>
    %97 = tpu.concatenate %36, %56, %76, %96 in 1 : vector<8x8xf32>, vector<8x8xf32>, vector<8x8xf32>, vector<8x8xf32> -> vector<8x32xf32>
    %c1_38 = arith.constant 1 : index
    %c0_39 = arith.constant 0 : index
    %c0_40 = arith.constant 0 : index
    %98 = vector.load %arg2[%c1_38, %c0_39, %c0_40] : memref<2x8x8xbf16, #tpu.memory_space<vmem>>, vector<1x8x8xbf16>
    %99 = vector.shape_cast %98 : vector<1x8x8xbf16> to vector<8x8xbf16>
    %100 = arith.extf %99 : vector<8x8xbf16> to vector<8x8xf32>
    %101 = vector.extract_strided_slice %9 {offsets = [8, 0], sizes = [8, 8], strides = [1, 1]} : vector<16x32xbf16> to vector<8x8xbf16>
    %102 = vector.extract_strided_slice %11 {offsets = [8, 0], sizes = [8, 8], strides = [1, 1]} : vector<16x32xbf16> to vector<8x8xbf16>
    %103 = vector.extract_strided_slice %13 {offsets = [8, 0], sizes = [8, 8], strides = [1, 1]} : vector<16x32xbf16> to vector<8x8xbf16>
    %cst_41 = arith.constant dense<0.000000e+00> : vector<8x8xf32>
    %104 = tpu.matmul %101, %102, %cst_41 {dimension_numbers = #tpu.dot_dimension_numbers<[1], [1], [0], [0], [0, 0, 1, 0], [], []>} : vector<8x8xbf16>, vector<8x8xbf16>, vector<8x8xf32> -> vector<8x8xf32>
    %105 = arith.addf %104, %100 : vector<8x8xf32>
    %cst_42 = arith.constant dense<0xFF800000> : vector<8xf32>
    %106 = vector.multi_reduction <maximumf>, %105, %cst_42 [1] : vector<8x8xf32> to vector<8xf32>
    %107 = vector.shape_cast %106 : vector<8xf32> to vector<8x1xf32>
    %108 = vector.broadcast %107 : vector<8x1xf32> to vector<8x8xf32>
    %109 = arith.subf %105, %108 : vector<8x8xf32>
    %110 = math.exp %109 : vector<8x8xf32>
    %cst_43 = arith.constant dense<0.000000e+00> : vector<8xf32>
    %111 = vector.multi_reduction <add>, %110, %cst_43 [1] : vector<8x8xf32> to vector<8xf32>
    %112 = vector.shape_cast %111 : vector<8xf32> to vector<8x1xf32>
    %113 = tpu.reciprocal %112 {approx = true} : vector<8x1xf32> -> vector<8x1xf32>
    %114 = vector.broadcast %113 : vector<8x1xf32> to vector<8x8xf32>
    %115 = arith.mulf %110, %114 : vector<8x8xf32>
    %c1_44 = arith.constant 1 : index
    %c0_45 = arith.constant 0 : index
    %c0_46 = arith.constant 0 : index
    %c0_47 = arith.constant 0 : index
    %116 = vector.load %arg8[%c1_44, %c0_45, %c0_46, %c0_47] : memref<2x4x8x8xf32, #tpu.memory_space<vmem>>, vector<1x1x8x8xf32>
    %117 = vector.shape_cast %116 : vector<1x1x8x8xf32> to vector<8x8xf32>
    %118 = vector.shape_cast %115 : vector<8x8xf32> to vector<1x1x8x8xf32>
    tpu.vector_store %arg8[%c1_44, %c0_45, %c0_46, %c0_47], %118 {strides = array<i32>} : memref<2x4x8x8xf32, #tpu.memory_space<vmem>>, vector<1x1x8x8xf32>,
    %119 = arith.truncf %115 : vector<8x8xf32> to vector<8x8xbf16>
    %cst_48 = arith.constant dense<0.000000e+00> : vector<8x8xf32>
    %120 = tpu.matmul %119, %103, %cst_48 {dimension_numbers = #tpu.dot_dimension_numbers<[1], [0], [0], [1], [0, 0, 1, 1], [], []>} : vector<8x8xbf16>, vector<8x8xbf16>, vector<8x8xf32> -> vector<8x8xf32>
    %121 = vector.extract_strided_slice %9 {offsets = [8, 8], sizes = [8, 8], strides = [1, 1]} : vector<16x32xbf16> to vector<8x8xbf16>
    %122 = vector.extract_strided_slice %11 {offsets = [8, 8], sizes = [8, 8], strides = [1, 1]} : vector<16x32xbf16> to vector<8x8xbf16>
    %123 = vector.extract_strided_slice %13 {offsets = [8, 8], sizes = [8, 8], strides = [1, 1]} : vector<16x32xbf16> to vector<8x8xbf16>
    %cst_49 = arith.constant dense<0.000000e+00> : vector<8x8xf32>
    %124 = tpu.matmul %121, %122, %cst_49 {dimension_numbers = #tpu.dot_dimension_numbers<[1], [1], [0], [0], [0, 0, 1, 0], [], []>} : vector<8x8xbf16>, vector<8x8xbf16>, vector<8x8xf32> -> vector<8x8xf32>
    %125 = arith.addf %124, %100 : vector<8x8xf32>
    %cst_50 = arith.constant dense<0xFF800000> : vector<8xf32>
    %126 = vector.multi_reduction <maximumf>, %125, %cst_50 [1] : vector<8x8xf32> to vector<8xf32>
    %127 = vector.shape_cast %126 : vector<8xf32> to vector<8x1xf32>
    %128 = vector.broadcast %127 : vector<8x1xf32> to vector<8x8xf32>
    %129 = arith.subf %125, %128 : vector<8x8xf32>
    %130 = math.exp %129 : vector<8x8xf32>
    %cst_51 = arith.constant dense<0.000000e+00> : vector<8xf32>
    %131 = vector.multi_reduction <add>, %130, %cst_51 [1] : vector<8x8xf32> to vector<8xf32>
    %132 = vector.shape_cast %131 : vector<8xf32> to vector<8x1xf32>
    %133 = tpu.reciprocal %132 {approx = true} : vector<8x1xf32> -> vector<8x1xf32>
    %134 = vector.broadcast %133 : vector<8x1xf32> to vector<8x8xf32>
    %135 = arith.mulf %130, %134 : vector<8x8xf32>
    %c1_52 = arith.constant 1 : index
    %c1_53 = arith.constant 1 : index
    %c0_54 = arith.constant 0 : index
    %c0_55 = arith.constant 0 : index
    %136 = vector.load %arg8[%c1_52, %c1_53, %c0_54, %c0_55] : memref<2x4x8x8xf32, #tpu.memory_space<vmem>>, vector<1x1x8x8xf32>
    %137 = vector.shape_cast %136 : vector<1x1x8x8xf32> to vector<8x8xf32>
    %138 = vector.shape_cast %135 : vector<8x8xf32> to vector<1x1x8x8xf32>
    tpu.vector_store %arg8[%c1_52, %c1_53, %c0_54, %c0_55], %138 {strides = array<i32>} : memref<2x4x8x8xf32, #tpu.memory_space<vmem>>, vector<1x1x8x8xf32>,
    %139 = arith.truncf %135 : vector<8x8xf32> to vector<8x8xbf16>
    %cst_56 = arith.constant dense<0.000000e+00> : vector<8x8xf32>
    %140 = tpu.matmul %139, %123, %cst_56 {dimension_numbers = #tpu.dot_dimension_numbers<[1], [0], [0], [1], [0, 0, 1, 1], [], []>} : vector<8x8xbf16>, vector<8x8xbf16>, vector<8x8xf32> -> vector<8x8xf32>
    %141 = vector.extract_strided_slice %9 {offsets = [8, 16], sizes = [8, 8], strides = [1, 1]} : vector<16x32xbf16> to vector<8x8xbf16>
    %142 = vector.extract_strided_slice %11 {offsets = [8, 16], sizes = [8, 8], strides = [1, 1]} : vector<16x32xbf16> to vector<8x8xbf16>
    %143 = vector.extract_strided_slice %13 {offsets = [8, 16], sizes = [8, 8], strides = [1, 1]} : vector<16x32xbf16> to vector<8x8xbf16>
    %cst_57 = arith.constant dense<0.000000e+00> : vector<8x8xf32>
    %144 = tpu.matmul %141, %142, %cst_57 {dimension_numbers = #tpu.dot_dimension_numbers<[1], [1], [0], [0], [0, 0, 1, 0], [], []>} : vector<8x8xbf16>, vector<8x8xbf16>, vector<8x8xf32> -> vector<8x8xf32>
    %145 = arith.addf %144, %100 : vector<8x8xf32>
    %cst_58 = arith.constant dense<0xFF800000> : vector<8xf32>
    %146 = vector.multi_reduction <maximumf>, %145, %cst_58 [1] : vector<8x8xf32> to vector<8xf32>
    %147 = vector.shape_cast %146 : vector<8xf32> to vector<8x1xf32>
    %148 = vector.broadcast %147 : vector<8x1xf32> to vector<8x8xf32>
    %149 = arith.subf %145, %148 : vector<8x8xf32>
    %150 = math.exp %149 : vector<8x8xf32>
    %cst_59 = arith.constant dense<0.000000e+00> : vector<8xf32>
    %151 = vector.multi_reduction <add>, %150, %cst_59 [1] : vector<8x8xf32> to vector<8xf32>
    %152 = vector.shape_cast %151 : vector<8xf32> to vector<8x1xf32>
    %153 = tpu.reciprocal %152 {approx = true} : vector<8x1xf32> -> vector<8x1xf32>
    %154 = vector.broadcast %153 : vector<8x1xf32> to vector<8x8xf32>
    %155 = arith.mulf %150, %154 : vector<8x8xf32>
    %c1_60 = arith.constant 1 : index
    %c2_61 = arith.constant 2 : index
    %c0_62 = arith.constant 0 : index
    %c0_63 = arith.constant 0 : index
    %156 = vector.load %arg8[%c1_60, %c2_61, %c0_62, %c0_63] : memref<2x4x8x8xf32, #tpu.memory_space<vmem>>, vector<1x1x8x8xf32>
    %157 = vector.shape_cast %156 : vector<1x1x8x8xf32> to vector<8x8xf32>
    %158 = vector.shape_cast %155 : vector<8x8xf32> to vector<1x1x8x8xf32>
    tpu.vector_store %arg8[%c1_60, %c2_61, %c0_62, %c0_63], %158 {strides = array<i32>} : memref<2x4x8x8xf32, #tpu.memory_space<vmem>>, vector<1x1x8x8xf32>,
    %159 = arith.truncf %155 : vector<8x8xf32> to vector<8x8xbf16>
    %cst_64 = arith.constant dense<0.000000e+00> : vector<8x8xf32>
    %160 = tpu.matmul %159, %143, %cst_64 {dimension_numbers = #tpu.dot_dimension_numbers<[1], [0], [0], [1], [0, 0, 1, 1], [], []>} : vector<8x8xbf16>, vector<8x8xbf16>, vector<8x8xf32> -> vector<8x8xf32>
    %161 = vector.extract_strided_slice %9 {offsets = [8, 24], sizes = [8, 8], strides = [1, 1]} : vector<16x32xbf16> to vector<8x8xbf16>
    %162 = vector.extract_strided_slice %11 {offsets = [8, 24], sizes = [8, 8], strides = [1, 1]} : vector<16x32xbf16> to vector<8x8xbf16>
    %163 = vector.extract_strided_slice %13 {offsets = [8, 24], sizes = [8, 8], strides = [1, 1]} : vector<16x32xbf16> to vector<8x8xbf16>
    %cst_65 = arith.constant dense<0.000000e+00> : vector<8x8xf32>
    %164 = tpu.matmul %161, %162, %cst_65 {dimension_numbers = #tpu.dot_dimension_numbers<[1], [1], [0], [0], [0, 0, 1, 0], [], []>} : vector<8x8xbf16>, vector<8x8xbf16>, vector<8x8xf32> -> vector<8x8xf32>
    %165 = arith.addf %164, %100 : vector<8x8xf32>
    %cst_66 = arith.constant dense<0xFF800000> : vector<8xf32>
    %166 = vector.multi_reduction <maximumf>, %165, %cst_66 [1] : vector<8x8xf32> to vector<8xf32>
    %167 = vector.shape_cast %166 : vector<8xf32> to vector<8x1xf32>
    %168 = vector.broadcast %167 : vector<8x1xf32> to vector<8x8xf32>
    %169 = arith.subf %165, %168 : vector<8x8xf32>
    %170 = math.exp %169 : vector<8x8xf32>
    %cst_67 = arith.constant dense<0.000000e+00> : vector<8xf32>
    %171 = vector.multi_reduction <add>, %170, %cst_67 [1] : vector<8x8xf32> to vector<8xf32>
    %172 = vector.shape_cast %171 : vector<8xf32> to vector<8x1xf32>
    %173 = tpu.reciprocal %172 {approx = true} : vector<8x1xf32> -> vector<8x1xf32>
    %174 = vector.broadcast %173 : vector<8x1xf32> to vector<8x8xf32>
    %175 = arith.mulf %170, %174 : vector<8x8xf32>
    %c1_68 = arith.constant 1 : index
    %c3_69 = arith.constant 3 : index
    %c0_70 = arith.constant 0 : index
    %c0_71 = arith.constant 0 : index
    %176 = vector.load %arg8[%c1_68, %c3_69, %c0_70, %c0_71] : memref<2x4x8x8xf32, #tpu.memory_space<vmem>>, vector<1x1x8x8xf32>
    %177 = vector.shape_cast %176 : vector<1x1x8x8xf32> to vector<8x8xf32>
    %178 = vector.shape_cast %175 : vector<8x8xf32> to vector<1x1x8x8xf32>
    tpu.vector_store %arg8[%c1_68, %c3_69, %c0_70, %c0_71], %178 {strides = array<i32>} : memref<2x4x8x8xf32, #tpu.memory_space<vmem>>, vector<1x1x8x8xf32>,
    %179 = arith.truncf %175 : vector<8x8xf32> to vector<8x8xbf16>
    %cst_72 = arith.constant dense<0.000000e+00> : vector<8x8xf32>
    %180 = tpu.matmul %179, %163, %cst_72 {dimension_numbers = #tpu.dot_dimension_numbers<[1], [0], [0], [1], [0, 0, 1, 1], [], []>} : vector<8x8xbf16>, vector<8x8xbf16>, vector<8x8xf32> -> vector<8x8xf32>
    %181 = tpu.concatenate %120, %140, %160, %180 in 1 : vector<8x8xf32>, vector<8x8xf32>, vector<8x8xf32>, vector<8x8xf32> -> vector<8x32xf32>
    %182 = tpu.concatenate %97, %181 in 0 : vector<8x32xf32>, vector<8x32xf32> -> vector<16x32xf32>
    %183 = arith.truncf %182 : vector<16x32xf32> to vector<16x32xbf16>
    %c0_73 = arith.constant 0 : index
    %c0_74 = arith.constant 0 : index
    %184 = vector.load %arg5[%c0_73, %c0_74] : memref<32x32xbf16, #tpu.memory_space<vmem>>, vector<32x32xbf16>
    %cst_75 = arith.constant dense<0.000000e+00> : vector<16x32xf32>
    %185 = tpu.matmul %183, %184, %cst_75 {dimension_numbers = #tpu.dot_dimension_numbers<[1], [0], [0], [1], [0, 0, 1, 1], [], []>} : vector<16x32xbf16>, vector<32x32xbf16>, vector<16x32xf32> -> vector<16x32xf32>
    %c0_76 = arith.constant 0 : index
    %c0_77 = arith.constant 0 : index
    %186 = vector.load %arg6[%c0_76, %c0_77] : memref<1x32xf32, #tpu.memory_space<vmem>>, vector<1x32xf32>
    %187 = vector.broadcast %186 : vector<1x32xf32> to vector<16x32xf32>
    %188 = arith.addf %185, %187 : vector<16x32xf32>
    %c0_78 = arith.constant 0 : index
    %c0_79 = arith.constant 0 : index
    %189 = vector.load %arg7[%c0_78, %c0_79] : memref<16x32xf32, #tpu.memory_space<vmem>>, vector<16x32xf32>
    tpu.vector_store %arg7[%c0_78, %c0_79], %188 {strides = array<i32>} : memref<16x32xf32, #tpu.memory_space<vmem>>, vector<16x32xf32>,
    return
  }
  func.func @transform_0(%arg0: i32) -> (i32, i32) {
    %c0_i32 = arith.constant 0 : i32
    %c0_i32_0 = arith.constant 0 : i32
    return %arg0, %c0_i32 : i32, i32
  }
  func.func @transform_1(%arg0: i32) -> (i32, i32, i32) {
    %c0_i32 = arith.constant 0 : i32
    %c0_i32_0 = arith.constant 0 : i32
    %c0_i32_1 = arith.constant 0 : i32
    return %arg0, %c0_i32, %c0_i32_0 : i32, i32, i32
  }
  func.func @transform_2(%arg0: i32) -> (i32, i32) {
    %c0_i32 = arith.constant 0 : i32
    %c0_i32_0 = arith.constant 0 : i32
    %c0_i32_1 = arith.constant 0 : i32
    return %c0_i32, %c0_i32_0 : i32, i32
  }
  func.func @transform_3(%arg0: i32) -> (i32, i32) {
    %c0_i32 = arith.constant 0 : i32
    %c0_i32_0 = arith.constant 0 : i32
    %c0_i32_1 = arith.constant 0 : i32
    return %c0_i32, %c0_i32_0 : i32, i32
  }
  func.func @transform_4(%arg0: i32) -> (i32, i32) {
    %c0_i32 = arith.constant 0 : i32
    %c0_i32_0 = arith.constant 0 : i32
    %c0_i32_1 = arith.constant 0 : i32
    return %c0_i32, %c0_i32_0 : i32, i32
  }
  func.func @transform_5(%arg0: i32) -> (i32, i32) {
    %c0_i32 = arith.constant 0 : i32
    %c0_i32_0 = arith.constant 0 : i32
    %c0_i32_1 = arith.constant 0 : i32
    return %c0_i32, %c0_i32_0 : i32, i32
  }
  func.func @transform_6(%arg0: i32) -> (i32, i32) {
    %c0_i32 = arith.constant 0 : i32
    %c0_i32_0 = arith.constant 0 : i32
    return %arg0, %c0_i32 : i32, i32
  }
  func.func @transform_7(%arg0: i32) -> (i32, i32, i32, i32) {
    %c0_i32 = arith.constant 0 : i32
    %c0_i32_0 = arith.constant 0 : i32
    %c0_i32_1 = arith.constant 0 : i32
    %c0_i32_2 = arith.constant 0 : i32
    return %arg0, %c0_i32, %c0_i32_0, %c0_i32_1 : i32, i32, i32, i32
  }
}

</mosaic_0001>

<bundles_post_ra>
// kernel: tpu_custom_call.1
= control target key start
LH: loop header
LB: loop body
LE: loop exit
PB: predicated region body
PF: predicated region fallthrough
CT: control target
= control target key end

     0   :  { %13 = vsyncpa [#allocation3], 0  ;;  %s1222_s0 = inlined_call_operand.hbm [shape: bf16[16,32], index: 0, kind: input, shape index: {}]   ;;  %s1223_s1 = inlined_call_operand.hbm [shape: bf16[2,8,8], index: 1, kind: input, shape index: {}]   ;;  %s1224_s2 = inlined_call_operand.hbm [shape: bf16[32,96], index: 2, kind: input, shape index: {}]   ;;  %s1225_s3 = inlined_call_operand.vmem [shape: f32[1,96], index: 3, kind: input, shape index: {}]   ;;  %s1226_s4 = inlined_call_operand.hbm [shape: bf16[32,32], index: 4, kind: input, shape index: {}]   ;;  %s1227_s5 = inlined_call_operand.vmem [shape: f32[1,32], index: 5, kind: input, shape index: {}]   ;;  %s1228_s6 = inlined_call_operand.hbm [shape: f32[16,32], index: 6, kind: output, shape index: {0}]   ;;  %s1229_s7 = inlined_call_operand.hbm [shape: f32[2,4,8,8], index: 7, kind: output, shape index: {1}]  }
   0x1   :  { %14 = vsyncpa [#allocation6], 0 }
   0x2   :  { %15 = vsyncpa [#allocation9], 0 }
   0x3   :  { %16 = vsyncpa [#allocation4], 0 }
   0x4   :  { %17 = vsyncpa [#allocation12], 0  ;;  %s35_s26 = sshll.u32 %s1223_s1, 4  ;;  %s999_s27 = smov [#allocation5]   ;;  %s36_s26 = int_to_ptr.hbm [resolvable:$true] %s35_s26 }
   0x5   :  { %s37_s28 = sshll.u32 %s999_s27, 4  ;;  %s22_s8 = sshll.u32 %s1222_s0, 4  ;;  %s38_s28 = int_to_ptr.vmem [resolvable:$true] %s37_s28  ;;  %s23_s8 = int_to_ptr.hbm [resolvable:$true] %s22_s8 }
   0x6   :  { %s1000_s9 = smov 64   ;;  %s1001_s10 = smov 4  }
   0x7   :  { %43 = dma.hbm_to_vmem [thread:$0]  %s36_s26, 128, %s38_s28, [#allocation6], %s1000_s9, %s1000_s9, %s1001_s10  }
   0x8   :  { %s1002_s11 = smov [#allocation2]   ;;  %s48_s1 = sshll.u32 %s1224_s2, 4  ;;  %s49_s1 = int_to_ptr.hbm [resolvable:$true] %s48_s1 }
   0x9   :  { %s24_s12 = sshll.u32 %s1002_s11, 4  ;;  %s63_s0 = sshll.u32 %s1226_s4, 4  ;;  %s25_s12 = int_to_ptr.vmem [resolvable:$true] %s24_s12  ;;  %s64_s0 = int_to_ptr.hbm [resolvable:$true] %s63_s0 }
   0xa   :  { %30 = dma.hbm_to_vmem [thread:$0]  %s23_s8, 128, %s25_s12, [#allocation3], %s1000_s9, %s1000_s9, %s1001_s10  }
   0xb   :  { %s1003_s17 = smov [#allocation7]   ;;  %s1004_s19 = smov [#allocation8]  }
   0xc   :  { %s50_s18 = sshll.u32 %s1003_s17, 4  ;;  %s65_s20 = sshll.u32 %s1004_s19, 4  ;;  %s51_s18 = int_to_ptr.vmem [resolvable:$true] %s50_s18  ;;  %s66_s20 = int_to_ptr.vmem [resolvable:$true] %s65_s20 }
   0xd   :  { %56 = dma.hbm_to_vmem [thread:$0]  %s49_s1, 256, %s51_s18, [#allocation6], %s1000_s9, %s1000_s9, %s1001_s10  }
   0xe   :  { %71 = dma.hbm_to_vmem [thread:$0]  %s64_s0, 256, %s66_s20, [#allocation9], %s1000_s9, %s1000_s9, %s1001_s10  }
   0xf   :  { %989 = dma.done.wait [#allocation3], 128  }
  0x10   :  { %990 = vsyncadd [#allocation3], 4294967168 }
  0x11   :  { %991 = dma.done.wait [#allocation6], 384  }
  0x12   :  { %992 = vsyncadd [#allocation6], 4294966912 }
  0x13   :  { %993 = dma.done.wait [#allocation9], 256  }
  0x14   :  { %994 = vsyncadd [#allocation9], 4294967040  ;;  %v771_v0 = vld [vmem:[#allocation7 + $0x8] sm:$0xff]  ;;  %v770_v1 = vld [vmem:[#allocation7] sm:$0xff]  ;;  %vm118_vm0 = vcmask 261120   ;;  %s1005_s21 = smov 96  }
  0x15   :  { %128 = vmatpush.bf16.msra.mxu0 %v771_v0  ;;  %v769_v2 = vld [vmem:[#allocation2] sm:$0xff]  ;;  %s1006_s22 = smov 104   ;;  %s1007_s23 = smov 120   ;;  %vm149_vm1 = vcmask 64512   ;;  %v142_v44 = vld [vmem:[#allocation5] sm:$0xff]   ;;  %vm187_vm2 = vcmask 1043456  }
  0x16   :  { %v811_v3 = vld [vmem:[%s1225_s3] ss:$0 sm:$0xff]  ;;  %s1008_s3 = smov 88   ;;  %s1009_s24 = smov 80   ;;  %v143_v45 = vunpack.c.l.bf16 %v142_v44  ;;  %v400_v58 = vunpack.c.h.bf16 %v142_v44  ;;  %vm394_vm3 = vcmask 130048   ;;  %vm396_vm4 = vcmask 195584  }
  0x17   :  { %s1010_s25 = smov 72   ;;  %s1011_s26 = smov 112  }
  0x18   :  { %s1012_s27 = smov 56   ;;  %s1013_s28 = smov 48  }
  0x19   :  { %129 = vmatpush.bf16.msra.mxu0 %v770_v1  ;;  %s1014_s29 = smov 40   ;;  %s1015_s30 = smov 8  }
  0x1a   :  { %s1016_s8 = smov 16   ;;  %s1018_s10 = smov [#allocation11]  }
  0x1b   :  { %s709_s11 = sshll.u32 %s1018_s10, 4  ;;  %s711_s14 = sshll.u32 %s1229_s7, 4  ;;  %s710_s11 = int_to_ptr.vmem [resolvable:$true] %s709_s11  ;;  %s712_s14 = int_to_ptr.hbm [resolvable:$true] %s711_s14 }
  0x1c   :  { %743 = vmatmul.msk.bf16.vlgmr.msra.gmra.mxu0 %vm118_vm0, %v769_v2  ;;  %s1019_s1 = smov 128   ;;  %s1020_s0 = smov [#allocation10]  }
  0x1d   :  { %s696_s17 = sshll.u32 %s1020_s0, 4  ;;  %s698_s20 = sshll.u32 %s1228_s6, 4  ;;  %s697_s17 = int_to_ptr.vmem [resolvable:$true] %s696_s17  ;;  %s699_s20 = int_to_ptr.hbm [resolvable:$true] %s698_s20 }
  0x99   :  { %v131_v4 = vpop.f32.mrf.mxu0 }
  0x9a   :  { %v132_v5 = vadd.f32 %v811_v3, %v131_v4 }
  0x9c   :  { %v136_v6 = vmul.f32 0.35355338, %v132_v5  ;;  %v140_v7 = vpack.c.bf16 %v132_v5, %v132_v5 }
  0x9e   :  { %v138_v8 = vpack.c.bf16 %v136_v6, %v136_v6  ;;  %v145_v9 = vunpack.c.l.b16 %v140_v7 }
  0xa0   :  { %v1085_v10 = vpack.c.b16 %v145_v9, %v145_v9  ;;  %v205_v11 = vunpack.c.l.b16 %v138_v8 }
  0xa1   :  { %v133_v12 = vpop.f32.mrf.mxu0 }
  0xa2   :  { %v134_v13 = vadd.f32 %v811_v3, %v133_v12  ;;  %147 = vrot.lane.b32.xlu0 %v1085_v10, %s1005_s21  ;;  %v206_v14 = vpack.c.b16 %v205_v11, %v205_v11 }
  0xa4   :  { %323 = vrot.lane.b32.xlu2 %v206_v14, %s1006_s22  ;;  %207 = vrot.lane.b32.xlu1 %v206_v14, %s1007_s23  ;;  %v137_v15 = vmul.f32 0.35355338, %v134_v13  ;;  %v141_v16 = vpack.c.bf16 %v134_v13, %v134_v13 }
  0xa6   :  { %v139_v17 = vpack.c.bf16 %v137_v15, %v137_v15  ;;  %v402_v18 = vunpack.c.l.b16 %v141_v16 }
  0xa8   :  { %v461_v19 = vunpack.c.l.b16 %v139_v17  ;;  %v1091_v20 = vpack.c.b16 %v402_v18, %v402_v18 }
  0xaa   :  { %209 = vrot.lane.b32.xlu0 %v1085_v10, %s1008_s3  ;;  %v462_v21 = vpack.c.b16 %v461_v19, %v461_v19 }
  0xac   :  { %267 = vrot.lane.b32.xlu2 %v1085_v10, %s1009_s24  ;;  %325 = vrot.lane.b32.xlu1 %v1085_v10, %s1010_s25 }
  0xb2   :  { %465 = vrot.lane.b32.xlu0 %v1091_v20, %s1008_s3 }
  0xb4   :  { %463 = vrot.lane.b32.xlu2 %v462_v21, %s1007_s23  ;;  %265 = vrot.lane.b32.xlu1 %v206_v14, %s1011_s26 }
  0xba   :  { %404 = vrot.lane.b32.xlu0 %v1091_v20, %s1005_s21 }
  0xbc   :  { %579 = vrot.lane.b32.xlu2 %v462_v21, %s1006_s22  ;;  %581 = vrot.lane.b32.xlu1 %v1091_v20, %s1010_s25 }
  0xc2   :  { %523 = vrot.lane.b32.xlu0 %v1091_v20, %s1009_s24 }
  0xc4   :  { %521 = vrot.lane.b32.xlu1 %v462_v21, %s1011_s26 }
  0xcc   :  { %244 = vrot.lane.b32.xlu1 %v1085_v10, %s1012_s27 }
  0xfe   :  { %v324_v22 = vpop.permute.xlu2 %323 }
 0x106   :  { %v268_v23 = vpop.permute.xlu2 %267 }
 0x107   :  { %v273_v24 = vsel %vm149_vm1, %v268_v23, 0 }
 0x108   :  { %282 = vmatpush.bf16.xpose.msrb.mxu0 %v273_v24 }
 0x10e   :  { %v464_v41 = vpop.permute.xlu2 %463 }
 0x114   :  { %v148_v25 = vpop.permute.xlu0 %147 }
 0x115   :  { %v154_v26 = vsel %vm149_vm1, %v148_v25, 0 }
 0x116   :  { %163 = vmatpush.bf16.xpose.msra.mxu1 %v154_v26  ;;  %v208_v27 = vpop.permute.xlu1 %207  ;;  %v580_v43 = vpop.permute.xlu2 %579 }
 0x11c   :  { %v210_v28 = vpop.permute.xlu0 %209 }
 0x11d   :  { %744 = vmatmul.msk.bf16.vlgmr.msra.gmra.mxu1 %vm149_vm1, %v138_v8  ;;  %v215_v29 = vsel %vm149_vm1, %v210_v28, 0 }
 0x11e   :  { %224 = vmatpush.bf16.xpose.msra.mxu3 %v215_v29  ;;  %v326_v30 = vpop.permute.xlu1 %325 }
 0x11f   :  { %v331_v31 = vsel %vm149_vm1, %v326_v30, 0 }
 0x124   :  { %v466_v32 = vpop.permute.xlu0 %465 }
 0x125   :  { %v471_v33 = vsel %vm149_vm1, %v466_v32, 0  ;;  %746 = vmatmul.msk.bf16.vlgmr.msra.gmra.mxu3 %vm149_vm1, %v208_v27 }
 0x126   :  { %340 = vmatpush.bf16.xpose.msrb.mxu3 %v331_v31  ;;  %v266_v34 = vpop.permute.xlu1 %265 }
 0x127   :  { %748 = vmatmul.msk.bf16.vlgmr.msrb.gmra.mxu0 %vm149_vm1, %v266_v34 }
 0x12c   :  { %v405_v35 = vpop.permute.xlu0 %404 }
 0x12d   :  { %v410_v36 = vsel %vm149_vm1, %v405_v35, 0 }
 0x12e   :  { %480 = vmatpush.bf16.xpose.msra.mxu3 %v471_v33  ;;  %419 = vmatpush.bf16.xpose.msra.mxu0 %v410_v36  ;;  %v582_v37 = vpop.permute.xlu1 %581 }
 0x12f   :  { %v587_v39 = vsel %vm149_vm1, %v582_v37, 0 }
 0x134   :  { %v524_v38 = vpop.permute.xlu0 %523 }
 0x135   :  { %v529_v40 = vsel %vm149_vm1, %v524_v38, 0  ;;  %750 = vmatmul.msk.bf16.vlgmr.msrb.gmra.mxu3 %vm149_vm1, %v324_v22 }
 0x136   :  { %596 = vmatpush.bf16.xpose.msrb.mxu3 %v587_v39  ;;  %538 = vmatpush.bf16.xpose.msrb.mxu0 %v529_v40  ;;  %v522_v42 = vpop.permute.xlu1 %521 }
 0x137   :  { %752 = vmatmul.msk.bf16.vlgmr.msra.gmra.mxu0 %vm149_vm1, %v139_v17 }
 0x13e   :  { %v245_v27 = vpop.permute.xlu1 %244 }
 0x13f   :  { %v250_v31 = vsel %vm187_vm2, %v245_v27, 0 }
 0x145   :  { %754 = vmatmul.msk.bf16.vlgmr.msra.gmra.mxu3 %vm149_vm1, %v464_v41 }
 0x147   :  { %756 = vmatmul.msk.bf16.vlgmr.msrb.gmra.mxu0 %vm149_vm1, %v522_v42 }
 0x155   :  { %758 = vmatmul.msk.bf16.vlgmr.msrb.gmra.mxu3 %vm149_vm1, %v580_v43 }
 0x19a   :  { %v165_v46 = vpop.f32.mrf.mxu1 }
 0x19b   :  { %v166_v47 = vadd.f32 %v165_v46, %v143_v45 }
 0x19d   :  { %v169_v48 = vsel %vm149_vm1, %v166_v47, -inf }
 0x19e   :  { %170 = vmax.xlane.f32.xlu2 %v169_v48 }
 0x1a2   :  { %v167_v49 = vpop.f32.mrf.mxu1 }
 0x1a4   :  { %v284_v50 = vpop.f32.mrf.mxu0 }
 0x1a5   :  { %v285_v51 = vadd.f32 %v284_v50, %v143_v45 }
 0x1a7   :  { %v288_v52 = vsel %vm149_vm1, %v285_v51, -inf }
 0x1a8   :  { %v226_v53 = vpop.f32.mrf.mxu3  ;;  %289 = vmax.xlane.f32.xlu2 %v288_v52 }
 0x1a9   :  { %v227_v54 = vadd.f32 %v226_v53, %v143_v45 }
 0x1ab   :  { %v230_v55 = vsel %vm149_vm1, %v227_v54, -inf }
 0x1ac   :  { %231 = vmax.xlane.f32.xlu0 %v230_v55  ;;  %v286_v56 = vpop.f32.mrf.mxu0 }
 0x1b0   :  { %v228_v57 = vpop.f32.mrf.mxu3 }
 0x1b4   :  { %v421_v59 = vpop.f32.mrf.mxu0 }
 0x1b5   :  { %v1118_v60 = vadd.f32 %v421_v59, %v400_v58 }
 0x1b7   :  { %v425_v61 = vsel %vm149_vm1, %v1118_v60, -inf }
 0x1b8   :  { %v342_v62 = vpop.f32.mrf.mxu3  ;;  %426 = vmax.xlane.f32.xlu1 %v425_v61 }
 0x1b9   :  { %v1122_v63 = vadd.f32 %v342_v62, %v143_v45 }
 0x1bb   :  { %v346_v1 = vsel %vm149_vm1, %v1122_v63, -inf }
 0x1bc   :  { %v423_v0 = vpop.f32.mrf.mxu0 }
 0x1c0   :  { %v344_v2 = vpop.f32.mrf.mxu3  ;;  %347 = vmax.xlane.f32.xlu1 %v346_v1  ;;  %182 = vrot.lane.b32.xlu2 %v1085_v10, %s1000_s9 }
 0x1c4   :  { %v540_v3 = vpop.f32.mrf.mxu0 }
 0x1c5   :  { %v1128_v4 = vadd.f32 %v540_v3, %v400_v58 }
 0x1c7   :  { %v544_v5 = vsel %vm149_vm1, %v1128_v4, -inf }
 0x1c8   :  { %v482_v6 = vpop.f32.mrf.mxu3  ;;  %545 = vmax.xlane.f32.xlu0 %v544_v5 }
 0x1c9   :  { %v483_v14 = vadd.f32 %v482_v6, %v400_v58 }
 0x1cb   :  { %v486_v15 = vsel %vm149_vm1, %v483_v14, -inf }
 0x1cc   :  { %v542_v7 = vpop.f32.mrf.mxu0 }
 0x1d0   :  { %v484_v8 = vpop.f32.mrf.mxu3 }
 0x1d8   :  { %v598_v9 = vpop.f32.mrf.mxu3 }
 0x1d9   :  { %v599_v11 = vadd.f32 %v598_v9, %v400_v58  ;;  %302 = vrot.lane.b32.xlu1 %v1085_v10, %s1013_s28 }
 0x1db   :  { %v602_v12 = vsel %vm149_vm1, %v599_v11, -inf }
 0x1dc   :  { %603 = vmax.xlane.f32.xlu0 %v602_v12 }
 0x1e0   :  { %v600_v13 = vpop.f32.mrf.mxu3 }
 0x1e9   :  { %487 = vmax.xlane.f32.xlu2 %v486_v15 }
 0x211   :  { %v171_v16 = vpop.xlane.xlu2 %170 }
 0x212   :  { %v172_v17 = vsub.f32 %v166_v47, %v171_v16 }
 0x214   :  { %v173_v18 = vmul.f32 1.442695, %v172_v17 }
 0x216   :  { %813 = vpow2.f32 %v173_v18 }
 0x21b   :  { %v290_v19 = vpop.xlane.xlu2 %289 }
 0x21c   :  { %v1136_v21 = vpop.eup %813  ;;  %v291_v22 = vsub.f32 %v285_v51, %v290_v19 }
 0x21d   :  { %v175_v23 = vsel %vm149_vm1, %v1136_v21, 0.0 }
 0x21e   :  { %v292_v24 = vmul.f32 1.442695, %v291_v22  ;;  %176 = vadd.xlane.f32.xlu0 %v175_v23 }
 0x21f   :  { %v232_v25 = vpop.xlane.xlu0 %231 }
 0x220   :  { %815 = vpow2.f32 %v292_v24  ;;  %v233_v26 = vsub.f32 %v227_v54, %v232_v25 }
 0x222   :  { %v234_v28 = vmul.f32 1.442695, %v233_v26 }
 0x223   :  { %v183_v29 = vpop.permute.xlu2 %182 }
 0x224   :  { %817 = vpow2.f32 %v234_v28  ;;  %v189_v30 = vsel %vm187_vm2, %v183_v29, 0 }
 0x225   :  { %198 = vmatpush.bf16.msra.mxu2 %v189_v30 }
 0x226   :  { %v1142_v32 = vpop.eup %815 }
 0x227   :  { %v294_v33 = vsel %vm149_vm1, %v1142_v32, 0.0 }
 0x228   :  { %295 = vadd.xlane.f32.xlu2 %v294_v33 }
 0x229   :  { %259 = vmatpush.bf16.msrb.mxu2 %v250_v31 }
 0x22a   :  { %v1146_v34 = vpop.eup %817 }
 0x22b   :  { %v236_v35 = vsel %vm149_vm1, %v1146_v34, 0.0  ;;  %v427_v36 = vpop.xlane.xlu1 %426 }
 0x22c   :  { %237 = vadd.xlane.f32.xlu1 %v236_v35  ;;  %v428_v38 = vsub.f32 %v1118_v60, %v427_v36 }
 0x22e   :  { %v429_v41 = vmul.f32 1.442695, %v428_v38 }
 0x230   :  { %819 = vpow2.f32 %v429_v41 }
 0x232   :  { %360 = vrot.lane.b32.xlu0 %v1085_v10, %s1014_s29 }
 0x233   :  { %v348_v37 = vpop.xlane.xlu1 %347 }
 0x234   :  { %v349_v43 = vsub.f32 %v1122_v63, %v348_v37 }
 0x236   :  { %v350_v10 = vmul.f32 1.442695, %v349_v43  ;;  %v820_v46 = vpop.eup %819 }
 0x237   :  { %v431_v49 = vsel %vm149_vm1, %v820_v46, 0.0 }
 0x238   :  { %821 = vpow2.f32 %v350_v10 }
 0x23b   :  { %v546_v42 = vpop.xlane.xlu0 %545 }
 0x23c   :  { %v547_v44 = vsub.f32 %v1128_v4, %v546_v42 }
 0x23e   :  { %v548_v48 = vmul.f32 1.442695, %v547_v44  ;;  %v822_v53 = vpop.eup %821 }
 0x23f   :  { %v352_v55 = vsel %vm149_vm1, %v822_v53, 0.0 }
 0x240   :  { %500 = vrot.lane.b32.xlu2 %v1091_v20, %s1012_s27  ;;  %823 = vpow2.f32 %v548_v48 }
 0x245   :  { %439 = vrot.lane.b32.xlu1 %v1091_v20, %s1000_s9  ;;  %s1017_s9 = smov 24  }
 0x246   :  { %v1162_v56 = vpop.eup %823 }
 0x247   :  { %v550_v58 = vsel %vm149_vm1, %v1162_v56, 0.0 }
 0x24b   :  { %v303_v39 = vpop.permute.xlu1 %302 }
 0x24c   :  { %v308_v40 = vsel %vm187_vm2, %v303_v39, 0 }
 0x24d   :  { %317 = vmatpush.bf16.msrb.mxu1 %v308_v40 }
 0x24f   :  { %v604_v45 = vpop.xlane.xlu0 %603 }
 0x250   :  { %v605_v47 = vsub.f32 %v599_v11, %v604_v45 }
 0x252   :  { %v606_v52 = vmul.f32 1.442695, %v605_v47 }
 0x254   :  { %825 = vpow2.f32 %v606_v52 }
 0x25a   :  { %v1164_v57 = vpop.eup %825 }
 0x25b   :  { %v608_v60 = vsel %vm149_vm1, %v1164_v57, 0.0 }
 0x25c   :  { %432 = vadd.xlane.f32.xlu0 %v431_v49  ;;  %v488_v50 = vpop.xlane.xlu2 %487 }
 0x25d   :  { %v489_v51 = vsub.f32 %v483_v14, %v488_v50 }
 0x25f   :  { %v490_v54 = vmul.f32 1.442695, %v489_v51 }
 0x261   :  { %827 = vpow2.f32 %v490_v54 }
 0x264   :  { %353 = vadd.xlane.f32.xlu0 %v352_v55 }
 0x267   :  { %v1168_v59 = vpop.eup %827 }
 0x268   :  { %v492_v61 = vsel %vm149_vm1, %v1168_v59, 0.0 }
 0x269   :  { %551 = vadd.xlane.f32.xlu2 %v550_v58 }
 0x26c   :  { %609 = vadd.xlane.f32.xlu0 %v608_v60  ;;  %v772_v60 = vld [vmem:[#allocation8] sm:$0xff] }
 0x26f   :  { %493 = vadd.xlane.f32.xlu1 %v492_v61 }
 0x280   :  { %616 = vrot.lane.b32.xlu0 %v1091_v20, %s1014_s29 }
 0x288   :  { %558 = vrot.lane.b32.xlu1 %v1091_v20, %s1013_s28 }
 0x291   :  { %v177_v62 = vpop.xlane.xlu0 %176 }
 0x292   :  { %829 = vrcp.f32 %v177_v62 }
 0x298   :  { %v830_v63 = vpop.eup %829 }
 0x299   :  { %v179_v0 = vmul.f32 %v830_v63, %v1136_v21 }
 0x29b   :  { %v296_v1 = vpop.xlane.xlu2 %295  ;;  %180 = vst.msk [vmem:[#allocation11] sm:$0xff] %vm149_vm1, %v179_v0  ;;  %v181_v2 = vpack.c.bf16 %v179_v0, %v179_v0 }
 0x29c   :  { %831 = vrcp.f32 %v296_v1 }
 0x29d   :  { %745 = vmatmul.msk.bf16.vlgmr.msra.gmra.mxu2 %vm149_vm1, %v181_v2 }
 0x29f   :  { %v238_v3 = vpop.xlane.xlu1 %237 }
 0x2a0   :  { %833 = vrcp.f32 %v238_v3 }
 0x2a2   :  { %v832_v4 = vpop.eup %831 }
 0x2a3   :  { %v298_v5 = vmul.f32 %v832_v4, %v1142_v32  ;;  %v501_v11 = vpop.permute.xlu2 %500 }
 0x2a4   :  { %v361_v6 = vpop.permute.xlu0 %360  ;;  %v506_v13 = vsel %vm187_vm2, %v501_v11, 0 }
 0x2a5   :  { %300 = vst.msk [vmem:[#allocation11 + $0x10] sm:$0xff] %vm149_vm1, %v298_v5  ;;  %v366_v20 = vsel %vm187_vm2, %v361_v6, 0  ;;  %v301_v7 = vpack.c.bf16 %v298_v5, %v298_v5 }
 0x2a6   :  { %v834_v8 = vpop.eup %833  ;;  %375 = vmatpush.bf16.msra.mxu2 %v366_v20 }
 0x2a7   :  { %v240_v9 = vmul.f32 %v834_v8, %v1146_v34  ;;  %749 = vmatmul.msk.bf16.vlgmr.msrb.gmra.mxu1 %vm149_vm1, %v301_v7 }
 0x2a9   :  { %242 = vst.msk [vmem:[#allocation11 + $0x8] sm:$0xff] %vm149_vm1, %v240_v9  ;;  %v243_v12 = vpack.c.bf16 %v240_v9, %v240_v9 }
 0x2ad   :  { %747 = vmatmul.msk.bf16.vlgmr.msrb.gmra.mxu2 %vm149_vm1, %v243_v12 }
 0x2ae   :  { %515 = vmatpush.bf16.msrb.mxu2 %v506_v13  ;;  %v812_v13 = vld [vmem:[%s1227_s5] ss:$0 sm:$0xff] }
 0x2b7   :  { %v440_v14 = vpop.permute.xlu1 %439 }
 0x2b8   :  { %v445_v15 = vsel %vm187_vm2, %v440_v14, 0 }
 0x2b9   :  { %454 = vmatpush.bf16.msra.mxu1 %v445_v15 }
 0x2cf   :  { %v433_v16 = vpop.xlane.xlu0 %432 }
 0x2d0   :  { %835 = vrcp.f32 %v433_v16 }
 0x2d6   :  { %v836_v17 = vpop.eup %835 }
 0x2d7   :  { %v435_v18 = vmul.f32 %v836_v17, %v820_v46  ;;  %v354_v19 = vpop.xlane.xlu0 %353 }
 0x2d8   :  { %837 = vrcp.f32 %v354_v19 }
 0x2d9   :  { %437 = vst.msk [vmem:[#allocation11 + $0x20] sm:$0xff] %vm149_vm1, %v435_v18  ;;  %v438_v21 = vpack.c.bf16 %v435_v18, %v435_v18 }
 0x2db   :  { %753 = vmatmul.msk.bf16.vlgmr.msra.gmra.mxu1 %vm149_vm1, %v438_v21 }
 0x2dc   :  { %v552_v22 = vpop.xlane.xlu2 %551 }
 0x2dd   :  { %839 = vrcp.f32 %v552_v22 }
 0x2de   :  { %v838_v23 = vpop.eup %837 }
 0x2df   :  { %v356_v24 = vmul.f32 %v838_v23, %v822_v53  ;;  %v610_v25 = vpop.xlane.xlu0 %609 }
 0x2e0   :  { %841 = vrcp.f32 %v610_v25 }
 0x2e1   :  { %358 = vst.msk [vmem:[#allocation11 + $0x18] sm:$0xff] %vm149_vm1, %v356_v24  ;;  %v359_v26 = vpack.c.bf16 %v356_v24, %v356_v24 }
 0x2e2   :  { %v494_v27 = vpop.xlane.xlu1 %493 }
 0x2e3   :  { %v840_v28 = vpop.eup %839  ;;  %843 = vrcp.f32 %v494_v27  ;;  %751 = vmatmul.msk.bf16.vlgmr.msra.gmra.mxu2 %vm149_vm1, %v359_v26 }
 0x2e4   :  { %v554_v29 = vmul.f32 %v840_v28, %v1162_v56 }
 0x2e6   :  { %v842_v30 = vpop.eup %841  ;;  %556 = vst.msk [vmem:[#allocation11 + $0x30] sm:$0xff] %vm149_vm1, %v554_v29  ;;  %v557_v39 = vpack.c.bf16 %v554_v29, %v554_v29 }
 0x2e7   :  { %v612_v31 = vmul.f32 %v842_v30, %v1164_v57 }
 0x2e9   :  { %v844_v32 = vpop.eup %843  ;;  %614 = vst.msk [vmem:[#allocation11 + $0x38] sm:$0xff] %vm149_vm1, %v612_v31  ;;  %v615_v40 = vpack.c.bf16 %v612_v31, %v612_v31 }
 0x2ea   :  { %v496_v33 = vmul.f32 %v844_v32, %v1168_v59  ;;  %v773_v59 = vld [vmem:[#allocation8 + $0x8] sm:$0xff] }
 0x2eb   :  { %682 = vmatpush.bf16.msra.mxu0 %v773_v59 }
 0x2ec   :  { %498 = vst.msk [vmem:[#allocation11 + $0x28] sm:$0xff] %vm149_vm1, %v496_v33  ;;  %v499_v34 = vpack.c.bf16 %v496_v33, %v496_v33 }
 0x2ed   :  { %717 = dma.vmem_to_hbm [thread:$0]  %s710_s11, 1024, %s712_s14, [#allocation12], %s1019_s1, %s1019_s1, %s1015_s30  }
 0x2ef   :  { %683 = vmatpush.bf16.msra.mxu0 %v772_v60 }
 0x2f2   :  { %v617_v35 = vpop.permute.xlu0 %616 }
 0x2f3   :  { %v622_v36 = vsel %vm187_vm2, %v617_v35, 0  ;;  %755 = vmatmul.msk.bf16.vlgmr.msrb.gmra.mxu2 %vm149_vm1, %v499_v34 }
 0x2f4   :  { %631 = vmatpush.bf16.msra.mxu2 %v622_v36 }
 0x2fa   :  { %v559_v37 = vpop.permute.xlu1 %558 }
 0x2fb   :  { %v564_v38 = vsel %vm187_vm2, %v559_v37, 0 }
 0x2fc   :  { %573 = vmatpush.bf16.msrb.mxu1 %v564_v38 }
 0x2ff   :  { %757 = vmatmul.msk.bf16.vlgmr.msrb.gmra.mxu1 %vm149_vm1, %v557_v39 }
 0x303   :  { %759 = vmatmul.msk.bf16.vlgmr.msra.gmra.mxu2 %vm149_vm1, %v615_v40 }
 0x320   :  { %v200_v41 = vpop.f32.mrf.mxu2 }
 0x324   :  { %v319_v42 = vpop.f32.mrf.mxu1 }
 0x328   :  { %v202_v43 = vpop.f32.mrf.mxu2 }
 0x32c   :  { %v321_v10 = vpop.f32.mrf.mxu1 }
 0x330   :  { %v261_v44 = vpop.f32.mrf.mxu2 }
 0x338   :  { %v263_v45 = vpop.f32.mrf.mxu2 }
 0x358   :  { %v456_v46 = vpop.f32.mrf.mxu1 }
 0x360   :  { %v458_v47 = vpop.f32.mrf.mxu1 }
 0x366   :  { %v377_v48 = vpop.f32.mrf.mxu2 }
 0x36e   :  { %v379_v49 = vpop.f32.mrf.mxu2 }
 0x376   :  { %v517_v50 = vpop.f32.mrf.mxu2 }
 0x377   :  { %v796_v51 = vpack.i.bf16 %v517_v50, %v261_v44 }
 0x379   :  { %797 = vrot.lane.b32.xlu0 %v796_v51, %s1015_s30 }
 0x37c   :  { %v575_v52 = vpop.f32.mrf.mxu1 }
 0x37d   :  { %v801_v53 = vpack.i.bf16 %v575_v52, %v319_v42 }
 0x37e   :  { %v519_v54 = vpop.f32.mrf.mxu2 }
 0x37f   :  { %802 = vrot.lane.b32.xlu1 %v801_v53, %s1016_s8 }
 0x384   :  { %v577_v55 = vpop.f32.mrf.mxu1 }
 0x386   :  { %v633_v56 = vpop.f32.mrf.mxu2 }
 0x387   :  { %v806_v57 = vpack.i.bf16 %v633_v56, %v377_v48 }
 0x389   :  { %807 = vrot.lane.b32.xlu0 %v806_v57, %s1017_s9 }
 0x38e   :  { %v635_v58 = vpop.f32.mrf.mxu2 }
 0x3eb   :  { %v798_v61 = vpop.permute.xlu0 %797 }
 0x3ec   :  { %v800_v63 = vunpack.i.h.bf16 %v798_v61  ;;  %v799_v0 = vunpack.i.l.bf16 %v798_v61 }
 0x3ee   :  { %v649_v4 = vsel %vm149_vm1, %v456_v46, %v800_v63  ;;  %v393_v5 = vsel %vm149_vm1, %v200_v41, %v799_v0 }
 0x3f1   :  { %v803_v62 = vpop.permute.xlu1 %802 }
 0x3f2   :  { %v805_v1 = vunpack.i.h.bf16 %v803_v62  ;;  %v804_v2 = vunpack.i.l.bf16 %v803_v62 }
 0x3f4   :  { %v650_v7 = vsel %vm394_vm3, %v649_v4, %v805_v1  ;;  %v395_v8 = vsel %vm394_vm3, %v393_v5, %v804_v2 }
 0x3fb   :  { %v808_v3 = vpop.permute.xlu0 %807 }
 0x3fc   :  { %v810_v6 = vunpack.i.h.bf16 %v808_v3  ;;  %v809_v20 = vunpack.i.l.bf16 %v808_v3 }
 0x3fe   :  { %v397_v9 = vsel %vm396_vm4, %v395_v8, %v809_v20  ;;  %v651_v11 = vsel %vm396_vm4, %v650_v7, %v810_v6 }
 0x3ff   :  { %v652_v12 = vpack.c.bf16 %v651_v11, %v397_v9 }
 0x401   :  { %768 = vmatmul.msk.bf16.vlgmr.msra.gmra.mxu0 %vm118_vm0, %v652_v12 }
 0x47e   :  { %v685_v14 = vpop.f32.mrf.mxu0 }
 0x47f   :  { %v686_v15 = vadd.f32 %v812_v13, %v685_v14 }
 0x481   :  { %690 = vst.msk [vmem:[#allocation10] sm:$0xff] %vm118_vm0, %v686_v15 }
 0x486   :  { %v687_v16 = vpop.f32.mrf.mxu0 }
 0x487   :  { %v688_v17 = vadd.f32 %v812_v13, %v687_v16 }
 0x489   :  { %691 = vst.msk [vmem:[#allocation10 + $0x8] sm:$0xff] %vm118_vm0, %v688_v17 }
 0x48a   :  { %704 = dma.vmem_to_hbm [thread:$0]  %s697_s17, 256, %s699_s20, [#allocation4], %s1019_s1, %s1019_s1, %s1015_s30  }
 0x48b   :  { %995 = dma.done.wait [#allocation4], 256  }
 0x48c   :  { %996 = vsyncadd [#allocation4], 4294967040 }
 0x48d   :  { %997 = dma.done.wait [#allocation12], 1024  }
 0x48e   :  { %998 = vsyncadd [#allocation12], 4294966272 }
 0x48f   :  { %726 = vsyncpa [#allocation3], 1 }
 0x490   :  { %727 = vsyncpa [#allocation6], 1 }
 0x491   :  { %728 = vsyncpa [#allocation9], 1 }
 0x492   :  { %729 = vsyncpa [#allocation4], 1 }
 0x493   :  { %730 = vsyncpa [#allocation12], 1 }

</bundles_post_ra>
